<compile_context>
chip_gen: v7x
topology: tpu7x:2x2x1
jax: 0.10.0
libtpu: 0.0.40
codegen_flags: <defaults>
</compile_context>

<pallas_src>
import functools

import jax
import jax.numpy as jnp
from jax.experimental import pallas as pl
from jax.experimental.pallas import tpu as pltpu


def _round_up(x, m):
    return (x + m - 1) // m * m


def _vae_kernel(x_ref, eps_ref,
                w1, b1, w2, b2, w3, b3, w4, b4, w5, b5, w6, b6,
                out_ref, meanvar_ref):
    """One batch tile: encoder -> reparameterize -> decoder (all dims 128-padded)."""
    f32 = jnp.float32
    bf16 = jnp.bfloat16

    x = x_ref[...]  # already bf16, lane-dense (896 = 7*128)

    # ---- encoder ----
    h = jnp.dot(x, w1[...], preferred_element_type=f32) + b1[...]
    h = jnp.maximum(h, 0.0)
    h = jnp.dot(h.astype(bf16), w2[...], preferred_element_type=f32) + b2[...]
    h = jnp.maximum(h, 0.0)

    # fused (mean || logvar) head: one (128, 256) matmul, lane-dense store
    mv = jnp.dot(h.astype(bf16), w3[...], preferred_element_type=f32) + b3[...]
    meanvar_ref[...] = mv

    latent_pad = mv.shape[-1] // 2        # 128 -> slices are lane-aligned
    mean = mv[:, :latent_pad]
    logvar = mv[:, latent_pad:]

    # ---- reparameterization on the full padded slab ----
    # padded lanes: logvar=0 -> std=1, eps=0, mean=0 -> z=0 (and w4 pad rows = 0)
    z = eps_ref[...] * jnp.exp(0.5 * logvar) + mean

    # ---- decoder ----
    d = jnp.dot(z.astype(bf16), w4[...], preferred_element_type=f32) + b4[...]
    d = jnp.maximum(d, 0.0)
    d = jnp.dot(d.astype(bf16), w5[...], preferred_element_type=f32) + b5[...]
    d = jnp.maximum(d, 0.0)
    logits = jnp.dot(d.astype(bf16), w6[...], preferred_element_type=f32) + b6[...]

    # exact sigmoid via a single EUP op (tanh); bf16 store halves HBM writeback
    out_ref[...] = (0.5 * jnp.tanh(0.5 * logits) + 0.5).astype(out_ref.dtype)


def init_vae_params(key, inp_dim, hid_l1_dim, hid_l2_dim, latent_dim):
    """Deterministic parameter init (weights as (in, out), biases as (1, out))."""
    dims = [
        ("l1", inp_dim, hid_l1_dim),
        ("l2", hid_l1_dim, hid_l2_dim),
        ("l31", hid_l2_dim, latent_dim),
        ("l32", hid_l2_dim, latent_dim),
        ("l4", latent_dim, hid_l2_dim),
        ("l5", hid_l2_dim, hid_l1_dim),
        ("l6", hid_l1_dim, inp_dim),
    ]
    params = {}
    keys = jax.random.split(key, 2 * len(dims))
    for i, (name, fan_in, fan_out) in enumerate(dims):
        bound = 1.0 / jnp.sqrt(jnp.float32(fan_in))
        w = jax.random.uniform(keys[2 * i], (fan_in, fan_out),
                               minval=-bound, maxval=bound, dtype=jnp.float32)
        b = jax.random.uniform(keys[2 * i + 1], (1, fan_out),
                               minval=-bound, maxval=bound, dtype=jnp.float32)
        params[name] = (w, b)
    return params


def pack_vae_params(params):
    """Pad every dim to a multiple of 128, fuse mean/logvar heads, cast weights bf16.

    Zero rows/cols + zero biases in the padded regions keep the padding a
    numerical no-op through ReLU / matmul / the reparameterization.
    """
    w1, b1 = params["l1"]
    w2, b2 = params["l2"]
    w31, b31 = params["l31"]
    w32, b32 = params["l32"]
    w4, b4 = params["l4"]
    w5, b5 = params["l5"]
    w6, b6 = params["l6"]

    inp, hid1 = w1.shape
    hid2 = w2.shape[1]
    latent = w31.shape[1]
    inp_p = _round_up(inp, 128)
    hid1_p = _round_up(hid1, 128)
    hid2_p = _round_up(hid2, 128)
    lat_p = _round_up(latent, 128)

    def padw(w, r, c):
        return jnp.zeros((r, c), jnp.float32).at[:w.shape[0], :w.shape[1]].set(w)

    def padb(b, c):
        return jnp.zeros((1, c), jnp.float32).at[:, :b.shape[1]].set(b)

    w1p, b1p = padw(w1, inp_p, hid1_p), padb(b1, hid1_p)
    w2p, b2p = padw(w2, hid1_p, hid2_p), padb(b2, hid2_p)

    # fused (mean || logvar) head, each half padded to lat_p lanes -> 2*lat_p wide
    w3p = jnp.zeros((hid2_p, 2 * lat_p), jnp.float32)
    w3p = w3p.at[:hid2, :latent].set(w31).at[:hid2, lat_p:lat_p + latent].set(w32)
    b3p = jnp.zeros((1, 2 * lat_p), jnp.float32)
    b3p = b3p.at[:, :latent].set(b31).at[:, lat_p:lat_p + latent].set(b32)

    w4p, b4p = padw(w4, lat_p, hid2_p), padb(b4, hid2_p)
    w5p, b5p = padw(w5, hid2_p, hid1_p), padb(b5, hid1_p)
    w6p, b6p = padw(w6, hid1_p, inp_p), padb(b6, inp_p)

    weights = [w.astype(jnp.bfloat16) for w in (w1p, w2p, w3p, w4p, w5p, w6p)]
    biases = (b1p, b2p, b3p, b4p, b5p, b6p)
    flat = []
    for w, b in zip(weights, biases):
        flat.extend((w, b))
    return tuple(flat)


@functools.partial(jax.jit, static_argnames=("inp_dim",))
def vae_forward(x, eps, flat_params, *, inp_dim):
    """x: any shape flattening to (-1, inp_dim); eps: (B, latent) std-normal noise.

    Returns (reconstruction, mean, logvar), matching the PyTorch forward().
    """
    w1 = flat_params[0]
    w3 = flat_params[4]
    inp_pad = w1.shape[0]
    latent_pad = w3.shape[1] // 2
    latent = eps.shape[1]

    x2d = x.reshape(-1, inp_dim)
    batch = x2d.shape[0]

    # Single materialized copy: 784 -> 896 feature pad folded with the bf16 cast.
    # No batch-dim padding: the grid handles the ragged last tile.
    x_pad = jnp.zeros((batch, inp_pad), jnp.bfloat16)
    x_pad = x_pad.at[:, :inp_dim].set(x2d.astype(jnp.bfloat16))
    eps_pad = jnp.zeros((batch, latent_pad), jnp.float32)
    eps_pad = eps_pad.at[:, :latent].set(eps.astype(jnp.float32))

    # Row tile: amortize per-step overhead, stay well under v7x's 64 MiB VMEM,
    # and give >= 2 grid steps when batch allows (v7x has 2 TensorCores).
    TM_CAP = 512
    if batch <= 8:
        tm = batch                      # block == full batch dim (allowed)
    else:
        tm = min(TM_CAP, max(8, _round_up(-(-batch // 2), 8)))
    grid = (pl.cdiv(batch, tm),)

    x_spec = pl.BlockSpec((tm, inp_pad), lambda i: (i, 0))
    eps_spec = pl.BlockSpec((tm, latent_pad), lambda i: (i, 0))
    # weights/biases: full-array blocks, constant index_map -> stay resident in VMEM
    # (pipeline_mode=pl.Buffered(1) would save a little VMEM on v5e; omitted since
    #  the working set already fits the 16 MiB scoped default with headroom)
    param_specs = [pl.BlockSpec(p.shape, lambda i: (0, 0)) for p in flat_params]

    out_specs = (
        pl.BlockSpec((tm, inp_pad), lambda i: (i, 0)),
        pl.BlockSpec((tm, 2 * latent_pad), lambda i: (i, 0)),
    )

    recon_pad, meanvar = pl.pallas_call(
        _vae_kernel,
        out_shape=(
            jax.ShapeDtypeStruct((batch, inp_pad), jnp.bfloat16),
            jax.ShapeDtypeStruct((batch, 2 * latent_pad), jnp.float32),
        ),
        grid=grid,
        in_specs=[x_spec, eps_spec] + param_specs,
        out_specs=out_specs,
        compiler_params=pltpu.CompilerParams(
            dimension_semantics=("parallel",),
            vmem_limit_bytes=32 * 1024 * 1024,
        ),
    )(x_pad, eps_pad, *flat_params)

    recon = recon_pad[:, :inp_dim].astype(jnp.float32)
    mean = meanvar[:, :latent]
    logvar = meanvar[:, latent_pad:latent_pad + latent]
    return recon, mean, logvar


def _reference_forward(x, eps, flat_params, inp_dim):
    """Pure-JAX reference with the same packed bf16 weights / f32 accumulation."""
    f32, bf16 = jnp.float32, jnp.bfloat16
    w1, b1, w2, b2, w3, b3, w4, b4, w5, b5, w6, b6 = flat_params
    inp_pad = w1.shape[0]
    lat_p = w3.shape[1] // 2
    latent = eps.shape[1]

    x2d = x.reshape(-1, inp_dim)
    xp = jnp.zeros((x2d.shape[0], inp_pad), bf16).at[:, :inp_dim].set(
        x2d.astype(bf16))
    ep = jnp.zeros((x2d.shape[0], lat_p), f32).at[:, :latent].set(eps)

    h = jax.nn.relu(jnp.dot(xp, w1, preferred_element_type=f32) + b1)
    h = jax.nn.relu(jnp.dot(h.astype(bf16), w2, preferred_element_type=f32) + b2)
    mv = jnp.dot(h.astype(bf16), w3, preferred_element_type=f32) + b3
    mean, logvar = mv[:, :lat_p], mv[:, lat_p:]
    z = ep * jnp.exp(0.5 * logvar) + mean
    d = jax.nn.relu(jnp.dot(z.astype(bf16), w4, preferred_element_type=f32) + b4)
    d = jax.nn.relu(jnp.dot(d.astype(bf16), w5, preferred_element_type=f32) + b5)
    logits = jnp.dot(d.astype(bf16), w6, preferred_element_type=f32) + b6
    return (jax.nn.sigmoid(logits)[:, :inp_dim],
            mean[:, :latent], logvar[:, :latent])


if __name__ == "__main__":
    # MNIST-like shapes: input (B, 1, 28, 28) -> view(-1, 784)
    INP_DIM = 784
    HID1 = 128
    HID2 = 64
    LATENT = 16
    BATCH = 2

    key = jax.random.PRNGKey(0)
    k_params, k_x, k_eps = jax.random.split(key, 3)

    params = init_vae_params(k_params, INP_DIM, HID1, HID2, LATENT)
    flat_params = pack_vae_params(params)

    x = jax.random.uniform(k_x, (BATCH, 1, 28, 28), dtype=jnp.float32)
    eps = jax.random.normal(k_eps, (BATCH, LATENT), dtype=jnp.float32)

    recon, mean, logvar = vae_forward(x, eps, flat_params, inp_dim=INP_DIM)
    jax.block_until_ready((recon, mean, logvar))

    assert recon.shape == (BATCH, INP_DIM)
    assert mean.shape == (BATCH, LATENT)
    assert logvar.shape == (BATCH, LATENT)
    assert bool(jnp.all(jnp.isfinite(recon)))

    # correctness check against a pure-JAX reference using the same bf16 weights
    r_ref, m_ref, lv_ref = _reference_forward(x, eps, flat_params, INP_DIM)
    assert bool(jnp.allclose(recon, r_ref, atol=2e-2)), "recon mismatch"
    assert bool(jnp.allclose(mean, m_ref, atol=2e-2)), "mean mismatch"
    assert bool(jnp.allclose(logvar, lv_ref, atol=2e-2)), "logvar mismatch"

    print("KERNEL_OK")
</pallas_src>

<mosaic_0001>
module attributes {stable_mosaic.version = 11 : i64} {
  func.func @_vae_kernel(%arg0: i32, %arg1: memref<2x896xbf16, #tpu.memory_space<vmem>>, %arg2: memref<2x128xf32, #tpu.memory_space<vmem>>, %arg3: memref<896x128xbf16, #tpu.memory_space<vmem>>, %arg4: memref<1x128xf32, #tpu.memory_space<vmem>>, %arg5: memref<128x128xbf16, #tpu.memory_space<vmem>>, %arg6: memref<1x128xf32, #tpu.memory_space<vmem>>, %arg7: memref<128x256xbf16, #tpu.memory_space<vmem>>, %arg8: memref<1x256xf32, #tpu.memory_space<vmem>>, %arg9: memref<128x128xbf16, #tpu.memory_space<vmem>>, %arg10: memref<1x128xf32, #tpu.memory_space<vmem>>, %arg11: memref<128x128xbf16, #tpu.memory_space<vmem>>, %arg12: memref<1x128xf32, #tpu.memory_space<vmem>>, %arg13: memref<128x896xbf16, #tpu.memory_space<vmem>>, %arg14: memref<1x896xf32, #tpu.memory_space<vmem>>, %arg15: memref<2x896xbf16, #tpu.memory_space<vmem>>, %arg16: memref<2x256xf32, #tpu.memory_space<vmem>>) attributes {dimension_semantics = [#tpu.dimension_semantics<parallel>], iteration_bounds = array<i64: 1>, scalar_prefetch = 0 : i64, scratch_operands = 0 : i64, tpu.core_type = #tpu.core_type<tc>, window_params = [{transform_indices = @transform_0, window_bounds = array<i64: 2, 896>}, {transform_indices = @transform_1, window_bounds = array<i64: 2, 128>}, {pipeline_mode = #tpu.pipeline_mode<synchronous>, transform_indices = @transform_2, window_bounds = array<i64: 896, 128>}, {pipeline_mode = #tpu.pipeline_mode<synchronous>, transform_indices = @transform_3, window_bounds = array<i64: 1, 128>}, {pipeline_mode = #tpu.pipeline_mode<synchronous>, transform_indices = @transform_4, window_bounds = array<i64: 128, 128>}, {pipeline_mode = #tpu.pipeline_mode<synchronous>, transform_indices = @transform_5, window_bounds = array<i64: 1, 128>}, {pipeline_mode = #tpu.pipeline_mode<synchronous>, transform_indices = @transform_6, window_bounds = array<i64: 128, 256>}, {pipeline_mode = #tpu.pipeline_mode<synchronous>, transform_indices = @transform_7, window_bounds = array<i64: 1, 256>}, {pipeline_mode = #tpu.pipeline_mode<synchronous>, transform_indices = @transform_8, window_bounds = array<i64: 128, 128>}, {pipeline_mode = #tpu.pipeline_mode<synchronous>, transform_indices = @transform_9, window_bounds = array<i64: 1, 128>}, {pipeline_mode = #tpu.pipeline_mode<synchronous>, transform_indices = @transform_10, window_bounds = array<i64: 128, 128>}, {pipeline_mode = #tpu.pipeline_mode<synchronous>, transform_indices = @transform_11, window_bounds = array<i64: 1, 128>}, {pipeline_mode = #tpu.pipeline_mode<synchronous>, transform_indices = @transform_12, window_bounds = array<i64: 128, 896>}, {pipeline_mode = #tpu.pipeline_mode<synchronous>, transform_indices = @transform_13, window_bounds = array<i64: 1, 896>}, {transform_indices = @transform_14, window_bounds = array<i64: 2, 896>}, {transform_indices = @transform_15, window_bounds = array<i64: 2, 256>}]} {
    %c0 = arith.constant 0 : index
    %c0_0 = arith.constant 0 : index
    %0 = vector.load %arg1[%c0, %c0_0] : memref<2x896xbf16, #tpu.memory_space<vmem>>, vector<2x896xbf16>
    %c0_1 = arith.constant 0 : index
    %c0_2 = arith.constant 0 : index
    %1 = vector.load %arg3[%c0_1, %c0_2] : memref<896x128xbf16, #tpu.memory_space<vmem>>, vector<896x128xbf16>
    %cst = arith.constant dense<0.000000e+00> : vector<2x128xf32>
    %2 = tpu.matmul %0, %1, %cst {dimension_numbers = #tpu.dot_dimension_numbers<[1], [0], [0], [1], [0, 0, 1, 1], [], []>} : vector<2x896xbf16>, vector<896x128xbf16>, vector<2x128xf32> -> vector<2x128xf32>
    %c0_3 = arith.constant 0 : index
    %c0_4 = arith.constant 0 : index
    %3 = vector.load %arg4[%c0_3, %c0_4] : memref<1x128xf32, #tpu.memory_space<vmem>>, vector<1x128xf32>
    %4 = vector.broadcast %3 : vector<1x128xf32> to vector<2x128xf32>
    %5 = arith.addf %2, %4 : vector<2x128xf32>
    %cst_5 = arith.constant 0.000000e+00 : f32
    %6 = vector.broadcast %cst_5 : f32 to vector<2x128xf32>
    %7 = arith.maximumf %5, %6 : vector<2x128xf32>
    %8 = arith.truncf %7 : vector<2x128xf32> to vector<2x128xbf16>
    %c0_6 = arith.constant 0 : index
    %c0_7 = arith.constant 0 : index
    %9 = vector.load %arg5[%c0_6, %c0_7] : memref<128x128xbf16, #tpu.memory_space<vmem>>, vector<128x128xbf16>
    %cst_8 = arith.constant dense<0.000000e+00> : vector<2x128xf32>
    %10 = tpu.matmul %8, %9, %cst_8 {dimension_numbers = #tpu.dot_dimension_numbers<[1], [0], [0], [1], [0, 0, 1, 1], [], []>} : vector<2x128xbf16>, vector<128x128xbf16>, vector<2x128xf32> -> vector<2x128xf32>
    %c0_9 = arith.constant 0 : index
    %c0_10 = arith.constant 0 : index
    %11 = vector.load %arg6[%c0_9, %c0_10] : memref<1x128xf32, #tpu.memory_space<vmem>>, vector<1x128xf32>
    %12 = vector.broadcast %11 : vector<1x128xf32> to vector<2x128xf32>
    %13 = arith.addf %10, %12 : vector<2x128xf32>
    %cst_11 = arith.constant 0.000000e+00 : f32
    %14 = vector.broadcast %cst_11 : f32 to vector<2x128xf32>
    %15 = arith.maximumf %13, %14 : vector<2x128xf32>
    %16 = arith.truncf %15 : vector<2x128xf32> to vector<2x128xbf16>
    %c0_12 = arith.constant 0 : index
    %c0_13 = arith.constant 0 : index
    %17 = vector.load %arg7[%c0_12, %c0_13] : memref<128x256xbf16, #tpu.memory_space<vmem>>, vector<128x256xbf16>
    %cst_14 = arith.constant dense<0.000000e+00> : vector<2x256xf32>
    %18 = tpu.matmul %16, %17, %cst_14 {dimension_numbers = #tpu.dot_dimension_numbers<[1], [0], [0], [1], [0, 0, 1, 1], [], []>} : vector<2x128xbf16>, vector<128x256xbf16>, vector<2x256xf32> -> vector<2x256xf32>
    %c0_15 = arith.constant 0 : index
    %c0_16 = arith.constant 0 : index
    %19 = vector.load %arg8[%c0_15, %c0_16] : memref<1x256xf32, #tpu.memory_space<vmem>>, vector<1x256xf32>
    %20 = vector.broadcast %19 : vector<1x256xf32> to vector<2x256xf32>
    %21 = arith.addf %18, %20 : vector<2x256xf32>
    %c0_17 = arith.constant 0 : index
    %c0_18 = arith.constant 0 : index
    %22 = vector.load %arg16[%c0_17, %c0_18] : memref<2x256xf32, #tpu.memory_space<vmem>>, vector<2x256xf32>
    tpu.vector_store %arg16[%c0_17, %c0_18], %21 {strides = array<i32>} : memref<2x256xf32, #tpu.memory_space<vmem>>, vector<2x256xf32>,
    %23 = vector.extract_strided_slice %21 {offsets = [0, 0], sizes = [2, 128], strides = [1, 1]} : vector<2x256xf32> to vector<2x128xf32>
    %24 = vector.extract_strided_slice %21 {offsets = [0, 128], sizes = [2, 128], strides = [1, 1]} : vector<2x256xf32> to vector<2x128xf32>
    %c0_19 = arith.constant 0 : index
    %c0_20 = arith.constant 0 : index
    %25 = vector.load %arg2[%c0_19, %c0_20] : memref<2x128xf32, #tpu.memory_space<vmem>>, vector<2x128xf32>
    %cst_21 = arith.constant 5.000000e-01 : f32
    %26 = vector.broadcast %cst_21 : f32 to vector<2x128xf32>
    %27 = arith.mulf %26, %24 : vector<2x128xf32>
    %28 = math.exp %27 : vector<2x128xf32>
    %29 = arith.mulf %25, %28 : vector<2x128xf32>
    %30 = arith.addf %29, %23 : vector<2x128xf32>
    %31 = arith.truncf %30 : vector<2x128xf32> to vector<2x128xbf16>
    %c0_22 = arith.constant 0 : index
    %c0_23 = arith.constant 0 : index
    %32 = vector.load %arg9[%c0_22, %c0_23] : memref<128x128xbf16, #tpu.memory_space<vmem>>, vector<128x128xbf16>
    %cst_24 = arith.constant dense<0.000000e+00> : vector<2x128xf32>
    %33 = tpu.matmul %31, %32, %cst_24 {dimension_numbers = #tpu.dot_dimension_numbers<[1], [0], [0], [1], [0, 0, 1, 1], [], []>} : vector<2x128xbf16>, vector<128x128xbf16>, vector<2x128xf32> -> vector<2x128xf32>
    %c0_25 = arith.constant 0 : index
    %c0_26 = arith.constant 0 : index
    %34 = vector.load %arg10[%c0_25, %c0_26] : memref<1x128xf32, #tpu.memory_space<vmem>>, vector<1x128xf32>
    %35 = vector.broadcast %34 : vector<1x128xf32> to vector<2x128xf32>
    %36 = arith.addf %33, %35 : vector<2x128xf32>
    %cst_27 = arith.constant 0.000000e+00 : f32
    %37 = vector.broadcast %cst_27 : f32 to vector<2x128xf32>
    %38 = arith.maximumf %36, %37 : vector<2x128xf32>
    %39 = arith.truncf %38 : vector<2x128xf32> to vector<2x128xbf16>
    %c0_28 = arith.constant 0 : index
    %c0_29 = arith.constant 0 : index
    %40 = vector.load %arg11[%c0_28, %c0_29] : memref<128x128xbf16, #tpu.memory_space<vmem>>, vector<128x128xbf16>
    %cst_30 = arith.constant dense<0.000000e+00> : vector<2x128xf32>
    %41 = tpu.matmul %39, %40, %cst_30 {dimension_numbers = #tpu.dot_dimension_numbers<[1], [0], [0], [1], [0, 0, 1, 1], [], []>} : vector<2x128xbf16>, vector<128x128xbf16>, vector<2x128xf32> -> vector<2x128xf32>
    %c0_31 = arith.constant 0 : index
    %c0_32 = arith.constant 0 : index
    %42 = vector.load %arg12[%c0_31, %c0_32] : memref<1x128xf32, #tpu.memory_space<vmem>>, vector<1x128xf32>
    %43 = vector.broadcast %42 : vector<1x128xf32> to vector<2x128xf32>
    %44 = arith.addf %41, %43 : vector<2x128xf32>
    %cst_33 = arith.constant 0.000000e+00 : f32
    %45 = vector.broadcast %cst_33 : f32 to vector<2x128xf32>
    %46 = arith.maximumf %44, %45 : vector<2x128xf32>
    %47 = arith.truncf %46 : vector<2x128xf32> to vector<2x128xbf16>
    %c0_34 = arith.constant 0 : index
    %c0_35 = arith.constant 0 : index
    %48 = vector.load %arg13[%c0_34, %c0_35] : memref<128x896xbf16, #tpu.memory_space<vmem>>, vector<128x896xbf16>
    %cst_36 = arith.constant dense<0.000000e+00> : vector<2x896xf32>
    %49 = tpu.matmul %47, %48, %cst_36 {dimension_numbers = #tpu.dot_dimension_numbers<[1], [0], [0], [1], [0, 0, 1, 1], [], []>} : vector<2x128xbf16>, vector<128x896xbf16>, vector<2x896xf32> -> vector<2x896xf32>
    %c0_37 = arith.constant 0 : index
    %c0_38 = arith.constant 0 : index
    %50 = vector.load %arg14[%c0_37, %c0_38] : memref<1x896xf32, #tpu.memory_space<vmem>>, vector<1x896xf32>
    %51 = vector.broadcast %50 : vector<1x896xf32> to vector<2x896xf32>
    %52 = arith.addf %49, %51 : vector<2x896xf32>
    %cst_39 = arith.constant 5.000000e-01 : f32
    %53 = vector.broadcast %cst_39 : f32 to vector<2x896xf32>
    %54 = arith.mulf %53, %52 : vector<2x896xf32>
    %55 = math.tanh %54 : vector<2x896xf32>
    %cst_40 = arith.constant 5.000000e-01 : f32
    %56 = vector.broadcast %cst_40 : f32 to vector<2x896xf32>
    %57 = arith.mulf %56, %55 : vector<2x896xf32>
    %cst_41 = arith.constant 5.000000e-01 : f32
    %58 = vector.broadcast %cst_41 : f32 to vector<2x896xf32>
    %59 = arith.addf %57, %58 : vector<2x896xf32>
    %60 = arith.truncf %59 : vector<2x896xf32> to vector<2x896xbf16>
    %c0_42 = arith.constant 0 : index
    %c0_43 = arith.constant 0 : index
    %61 = vector.load %arg15[%c0_42, %c0_43] : memref<2x896xbf16, #tpu.memory_space<vmem>>, vector<2x896xbf16>
    tpu.vector_store %arg15[%c0_42, %c0_43], %60 {strides = array<i32>} : memref<2x896xbf16, #tpu.memory_space<vmem>>, vector<2x896xbf16>,
    return
  }
  func.func @transform_0(%arg0: i32) -> (i32, i32) {
    %c0_i32 = arith.constant 0 : i32
    %c0_i32_0 = arith.constant 0 : i32
    return %arg0, %c0_i32 : i32, i32
  }
  func.func @transform_1(%arg0: i32) -> (i32, i32) {
    %c0_i32 = arith.constant 0 : i32
    %c0_i32_0 = arith.constant 0 : i32
    return %arg0, %c0_i32 : i32, i32
  }
  func.func @transform_2(%arg0: i32) -> (i32, i32) {
    %c0_i32 = arith.constant 0 : i32
    %c0_i32_0 = arith.constant 0 : i32
    %c0_i32_1 = arith.constant 0 : i32
    return %c0_i32, %c0_i32_0 : i32, i32
  }
  func.func @transform_3(%arg0: i32) -> (i32, i32) {
    %c0_i32 = arith.constant 0 : i32
    %c0_i32_0 = arith.constant 0 : i32
    %c0_i32_1 = arith.constant 0 : i32
    return %c0_i32, %c0_i32_0 : i32, i32
  }
  func.func @transform_4(%arg0: i32) -> (i32, i32) {
    %c0_i32 = arith.constant 0 : i32
    %c0_i32_0 = arith.constant 0 : i32
    %c0_i32_1 = arith.constant 0 : i32
    return %c0_i32, %c0_i32_0 : i32, i32
  }
  func.func @transform_5(%arg0: i32) -> (i32, i32) {
    %c0_i32 = arith.constant 0 : i32
    %c0_i32_0 = arith.constant 0 : i32
    %c0_i32_1 = arith.constant 0 : i32
    return %c0_i32, %c0_i32_0 : i32, i32
  }
  func.func @transform_6(%arg0: i32) -> (i32, i32) {
    %c0_i32 = arith.constant 0 : i32
    %c0_i32_0 = arith.constant 0 : i32
    %c0_i32_1 = arith.constant 0 : i32
    return %c0_i32, %c0_i32_0 : i32, i32
  }
  func.func @transform_7(%arg0: i32) -> (i32, i32) {
    %c0_i32 = arith.constant 0 : i32
    %c0_i32_0 = arith.constant 0 : i32
    %c0_i32_1 = arith.constant 0 : i32
    return %c0_i32, %c0_i32_0 : i32, i32
  }
  func.func @transform_8(%arg0: i32) -> (i32, i32) {
    %c0_i32 = arith.constant 0 : i32
    %c0_i32_0 = arith.constant 0 : i32
    %c0_i32_1 = arith.constant 0 : i32
    return %c0_i32, %c0_i32_0 : i32, i32
  }
  func.func @transform_9(%arg0: i32) -> (i32, i32) {
    %c0_i32 = arith.constant 0 : i32
    %c0_i32_0 = arith.constant 0 : i32
    %c0_i32_1 = arith.constant 0 : i32
    return %c0_i32, %c0_i32_0 : i32, i32
  }
  func.func @transform_10(%arg0: i32) -> (i32, i32) {
    %c0_i32 = arith.constant 0 : i32
    %c0_i32_0 = arith.constant 0 : i32
    %c0_i32_1 = arith.constant 0 : i32
    return %c0_i32, %c0_i32_0 : i32, i32
  }
  func.func @transform_11(%arg0: i32) -> (i32, i32) {
    %c0_i32 = arith.constant 0 : i32
    %c0_i32_0 = arith.constant 0 : i32
    %c0_i32_1 = arith.constant 0 : i32
    return %c0_i32, %c0_i32_0 : i32, i32
  }
  func.func @transform_12(%arg0: i32) -> (i32, i32) {
    %c0_i32 = arith.constant 0 : i32
    %c0_i32_0 = arith.constant 0 : i32
    %c0_i32_1 = arith.constant 0 : i32
    return %c0_i32, %c0_i32_0 : i32, i32
  }
  func.func @transform_13(%arg0: i32) -> (i32, i32) {
    %c0_i32 = arith.constant 0 : i32
    %c0_i32_0 = arith.constant 0 : i32
    %c0_i32_1 = arith.constant 0 : i32
    return %c0_i32, %c0_i32_0 : i32, i32
  }
  func.func @transform_14(%arg0: i32) -> (i32, i32) {
    %c0_i32 = arith.constant 0 : i32
    %c0_i32_0 = arith.constant 0 : i32
    return %arg0, %c0_i32 : i32, i32
  }
  func.func @transform_15(%arg0: i32) -> (i32, i32) {
    %c0_i32 = arith.constant 0 : i32
    %c0_i32_0 = arith.constant 0 : i32
    return %arg0, %c0_i32 : i32, i32
  }
}

</mosaic_0001>

<bundles_post_ra>
// kernel: vae_forward.1
= control target key start
LH: loop header
LB: loop body
LE: loop exit
PB: predicated region body
PF: predicated region fallthrough
CT: control target
= control target key end

     0   :  { %21 = vsyncpa [#allocation3], 0  ;;  %s3003_s0 = inlined_call_operand.vmem [shape: bf16[2,896], index: 0, kind: input, shape index: {}]   ;;  %s3004_s1 = inlined_call_operand.vmem [shape: f32[2,128], index: 1, kind: input, shape index: {}]   ;;  %s3005_s2 = inlined_call_operand.hbm [shape: bf16[896,128], index: 2, kind: input, shape index: {}]   ;;  %s3006_s3 = inlined_call_operand.vmem [shape: f32[1,128], index: 3, kind: input, shape index: {}]   ;;  %s3007_s4 = inlined_call_operand.hbm [shape: bf16[128,128], index: 4, kind: input, shape index: {}]   ;;  %s3008_s5 = inlined_call_operand.vmem [shape: f32[1,128], index: 5, kind: input, shape index: {}]   ;;  %s3009_s6 = inlined_call_operand.vmem [shape: bf16[128,256], index: 6, kind: input, shape index: {}]   ;;  %s3010_s7 = inlined_call_operand.vmem [shape: f32[1,256], index: 7, kind: input, shape index: {}]   ;;  %s3011_s8 = inlined_call_operand.hbm [shape: bf16[128,128], index: 8, kind: input, shape index: {}]   ;;  %s3012_s9 = inlined_call_operand.vmem [shape: f32[1,128], index: 9, kind: input, shape index: {}]   ;;  %s3013_s10 = inlined_call_operand.hbm [shape: bf16[128,128], index: 10, kind: input, shape index: {}]   ;;  %s3014_s11 = inlined_call_operand.vmem [shape: f32[1,128], index: 11, kind: input, shape index: {}]   ;;  %s3015_s12 = inlined_call_operand.hbm [shape: bf16[128,896], index: 12, kind: input, shape index: {}]   ;;  %s3016_s13 = inlined_call_operand.vmem [shape: f32[1,896], index: 13, kind: input, shape index: {}]   ;;  %s3017_s14 = inlined_call_operand.vmem [shape: bf16[2,896], index: 14, kind: output, shape index: {0}]   ;;  %s3018_s15 = inlined_call_operand.vmem [shape: f32[2,256], index: 15, kind: output, shape index: {1}]  }
   0x1   :  { %22 = vsyncpa [#allocation5], 0 }
   0x2   :  { %23 = vsyncpa [#allocation8], 0  ;;  %s2655_s18 = smov [#allocation4]   ;;  %s2656_s20 = smov [#allocation7]  }
   0x3   :  { %s47_s19 = sshll.u32 %s2655_s18, 4  ;;  %s79_s21 = sshll.u32 %s2656_s20, 4  ;;  %s48_s19 = int_to_ptr.vmem [resolvable:$true] %s47_s19  ;;  %s2748_s21 = int_to_ptr.vmem [resolvable:$true] %s79_s21 }
   0x4   :  { %s2539_s24 = scalar_lea.hbm %s3007_s4, 1024 }
   0x5   :  { %p2540_p0 = scmp.ne.s32.totalorder %s3007_s4, %s2539_s24  ;;  %p2543_p1 = scmp.lt.u32.totalorder %s2539_s24, %s3007_s4 }
   0x7   :  { %p2545_p2 = pnand %p2543_p1, %p2540_p0 }
   0x9   :  { %2548 = shalt.err (!%p2545_p2)
}
   0xa   :  { %s2549_s29 = scalar_lea.vmem %s48_s19, 1024  ;;  %p2554_p4 = scmp.lt.s32.totalorder %s48_s19, %s48_s19 }
   0xb   :  { %p2550_p3 = scmp.ne.s32.totalorder %s48_s19, %s2549_s29  ;;  %p2555_p5 = scmp.lt.s32.totalorder %s2549_s29, %s2549_s29 }
   0xd   :  { %p2556_p6 = por %p2555_p5, %p2554_p4 }
   0xf   :  { %p2557_p7 = pnand %p2556_p6, %p2550_p3 }
  0x11   :  { %2560 = shalt.err (!%p2557_p7)
}
  0x12   :  { %s2657_s30 = smov 64   ;;  %s2658_s16 = smov 4  }
  0x13   :  { %53 = dma.hbm_to_vmem [thread:$0]  %s3007_s4, 1024, %s48_s19, [#allocation5], %s2657_s30, %s2657_s30, %s2658_s16  }
  0x14   :  { %s2561_s23 = scalar_lea.hbm %s3013_s10, 1024 }
  0x15   :  { %p2562_p8 = scmp.ne.s32.totalorder %s3013_s10, %s2561_s23  ;;  %p2565_p9 = scmp.lt.u32.totalorder %s2561_s23, %s3013_s10 }
  0x17   :  { %p2567_p10 = pnand %p2565_p9, %p2562_p8 }
  0x19   :  { %2570 = shalt.err (!%p2567_p10)
}
  0x1a   :  { %s2571_s28 = scalar_lea.vmem %s2748_s21, 1024  ;;  %p2576_p12 = scmp.lt.s32.totalorder %s2748_s21, %s2748_s21 }
  0x1b   :  { %p2572_p11 = scmp.ne.s32.totalorder %s2748_s21, %s2571_s28  ;;  %p2577_p13 = scmp.lt.s32.totalorder %s2571_s28, %s2571_s28 }
  0x1d   :  { %p2578_p0 = por %p2577_p13, %p2576_p12 }
  0x1f   :  { %p2579_p1 = pnand %p2578_p0, %p2572_p11 }
  0x21   :  { %2582 = shalt.err (!%p2579_p1)
}
  0x22   :  { %85 = dma.hbm_to_vmem [thread:$0]  %s3013_s10, 1024, %s2748_s21, [#allocation8], %s2657_s30, %s2657_s30, %s2658_s16  }
  0x23   :  { %s2659_s29 = smov [#allocation2]   ;;  %s2660_s18 = smov [#allocation6]  }
  0x24   :  { %s33_s17 = sshll.u32 %s2659_s29, 4  ;;  %s65_s20 = sshll.u32 %s2660_s18, 4  ;;  %s34_s17 = int_to_ptr.vmem [resolvable:$true] %s33_s17  ;;  %s2785_s20 = int_to_ptr.vmem [resolvable:$true] %s65_s20 }
  0x25   :  { %s2583_s24 = scalar_lea.hbm %s3005_s2, 7168 }
  0x26   :  { %p2584_p2 = scmp.ne.s32.totalorder %s3005_s2, %s2583_s24  ;;  %p2587_p3 = scmp.lt.u32.totalorder %s2583_s24, %s3005_s2 }
  0x28   :  { %p2589_p4 = pnand %p2587_p3, %p2584_p2 }
  0x2a   :  { %2592 = shalt.err (!%p2589_p4)
}
  0x2b   :  { %s2593_s10 = scalar_lea.vmem %s34_s17, 7168  ;;  %p2598_p6 = scmp.lt.s32.totalorder %s34_s17, %s34_s17 }
  0x2c   :  { %p2594_p5 = scmp.ne.s32.totalorder %s34_s17, %s2593_s10  ;;  %p2599_p7 = scmp.lt.s32.totalorder %s2593_s10, %s2593_s10 }
  0x2e   :  { %p2600_p8 = por %p2599_p7, %p2598_p6 }
  0x30   :  { %p2601_p9 = pnand %p2600_p8, %p2594_p5 }
  0x32   :  { %2604 = shalt.err (!%p2601_p9)
}
  0x33   :  { %39 = dma.hbm_to_vmem [thread:$0]  %s3005_s2, 7168, %s34_s17, [#allocation3], %s2657_s30, %s2657_s30, %s2658_s16  }
  0x34   :  { %s2605_s18 = scalar_lea.hbm %s3011_s8, 1024 }
  0x35   :  { %p2606_p10 = scmp.ne.s32.totalorder %s3011_s8, %s2605_s18  ;;  %p2609_p11 = scmp.lt.u32.totalorder %s2605_s18, %s3011_s8 }
  0x37   :  { %p2611_p12 = pnand %p2609_p11, %p2606_p10 }
  0x39   :  { %2614 = shalt.err (!%p2611_p12)
}
  0x3a   :  { %s2615_s26 = scalar_lea.vmem %s2785_s20, 1024  ;;  %p2620_p0 = scmp.lt.s32.totalorder %s2785_s20, %s2785_s20 }
  0x3b   :  { %p2616_p13 = scmp.ne.s32.totalorder %s2785_s20, %s2615_s26  ;;  %p2621_p1 = scmp.lt.s32.totalorder %s2615_s26, %s2615_s26 }
  0x3d   :  { %p2622_p2 = por %p2621_p1, %p2620_p0 }
  0x3f   :  { %p2623_p3 = pnand %p2622_p2, %p2616_p13 }
  0x41   :  { %2626 = shalt.err (!%p2623_p3)
}
  0x42   :  { %71 = dma.hbm_to_vmem [thread:$0]  %s3011_s8, 1024, %s2785_s20, [#allocation5], %s2657_s30, %s2657_s30, %s2658_s16  }
  0x43   :  { %s2661_s27 = smov [#allocation9]   ;;  %s2627_s4 = scalar_lea.hbm %s3015_s12, 7168 }
  0x44   :  { %s93_s28 = sshll.u32 %s2661_s27, 4  ;;  %p2628_p4 = scmp.ne.s32.totalorder %s3015_s12, %s2627_s4  ;;  %s94_s28 = int_to_ptr.vmem [resolvable:$true] %s93_s28 }
  0x45   :  { %p2631_p5 = scmp.lt.u32.totalorder %s2627_s4, %s3015_s12 }
  0x47   :  { %p2633_p6 = pnand %p2631_p5, %p2628_p4 }
  0x49   :  { %2636 = shalt.err (!%p2633_p6)
}
  0x4a   :  { %s2637_s23 = scalar_lea.vmem %s94_s28, 7168  ;;  %p2642_p8 = scmp.lt.s32.totalorder %s94_s28, %s94_s28 }
  0x4b   :  { %p2638_p7 = scmp.ne.s32.totalorder %s94_s28, %s2637_s23  ;;  %p2643_p9 = scmp.lt.s32.totalorder %s2637_s23, %s2637_s23 }
  0x4d   :  { %p2644_p10 = por %p2643_p9, %p2642_p8 }
  0x4f   :  { %p2645_p11 = pnand %p2644_p10, %p2638_p7 }
  0x51   :  { %2648 = shalt.err (!%p2645_p11)
}
  0x52   :  { %s2662_s8 = smov 448   ;;  %s2663_s30 = smov 28  }
  0x53   :  { %99 = dma.hbm_to_vmem [thread:$0]  %s3015_s12, 7168, %s94_s28, [#allocation8], %s2662_s8, %s2662_s8, %s2663_s30  }
  0x54   :  { %2649 = dma.done.wait [#allocation3], 7168  }
  0x55   :  { %2650 = vsyncadd [#allocation3], 4294960128 }
  0x56   :  { %2651 = dma.done.wait [#allocation5], 2048  }
  0x57   :  { %2652 = vsyncadd [#allocation5], 4294965248 }
  0x58   :  { %2653 = dma.done.wait [#allocation8], 8192  }
  0x59   :  { %2654 = vsyncadd [#allocation8], 4294959104  ;;  %v2338_v0 = vld [vmem:[#allocation2 + $0x40] sm:$0xff]   ;;  %v2342_v4 = vld [vmem:[#allocation2 + $0x48] sm:$0xff]   ;;  %v2664_v21 = vmov 1966171168   ;;  %v243_v23 = vlaneseq }
  0x5a   :  { %v2339_v1 = vld [vmem:[#allocation2] sm:$0xff]   ;;  %2114 = vmatprep.subr.bf16.mxu0 %v2338_v0  ;;  %v2343_v5 = vld [vmem:[#allocation2 + $0x8] sm:$0xff]   ;;  %v2346_v8 = vld [vmem:[#allocation2 + $0x50] sm:$0xff]   ;;  %v241_v22 = vunpack.c.l.s4 %v2664_v21  ;;  %v2665_v45 = vmov 0.0   ;;  %vm2666_vm0 = vmmov 0  }
  0x5b   :  { %v2340_v2 = vld [vmem:[#allocation2 + $0xc0] sm:$0xff]   ;;  %2115 = vmatpush3.bf16.msra.mxu0 %v2339_v1  ;;  %v2344_v6 = vld [vmem:[#allocation2 + $0xc8] sm:$0xff]   ;;  %v2347_v9 = vld [vmem:[#allocation2 + $0x10] sm:$0xff]   ;;  %v2834_v29 = vshrl.u32 %v243_v23, 7 }
  0x5c   :  { %v2341_v3 = vld [vmem:[#allocation2 + $0x80] sm:$0xff]   ;;  %2136 = vmatprep.subr.bf16.mxu1 %v2340_v2  ;;  %2116 = vmatprep.subr.bf16.mxu0 %v2342_v4  ;;  %v2345_v7 = vld [vmem:[#allocation2 + $0x88] sm:$0xff]   ;;  %v2348_v10 = vld [vmem:[#allocation2 + $0xd0] sm:$0xff]   ;;  %v242_v28 = vunpack.c.0.s8 %v241_v22 }
  0x5d   :  { %2137 = vmatpush3.bf16.msra.mxu1 %v2341_v3  ;;  %v2349_v11 = vld [vmem:[#allocation2 + $0x90] sm:$0xff]   ;;  %v2350_v12 = vld [vmem:[#allocation2 + $0x58] sm:$0xff]   ;;  %v2354_v16 = vld [vmem:[#allocation2 + $0x60] sm:$0xff]  }
  0x5e   :  { %2138 = vmatprep.subr.bf16.mxu1 %v2344_v6  ;;  %v2351_v13 = vld [vmem:[#allocation2 + $0x18] sm:$0xff]   ;;  %v2355_v17 = vld [vmem:[#allocation2 + $0x20] sm:$0xff]   ;;  %v2358_v20 = vld [vmem:[#allocation2 + $0x68] sm:$0xff]   ;;  %v2837_v34 = vsub.s32 %v242_v28, %v2834_v29 }
  0x5f   :  { %2117 = vmatpush3.bf16.msra.mxu0 %v2343_v5  ;;  %v2352_v14 = vld [vmem:[#allocation2 + $0xd8] sm:$0xff]   ;;  %v2356_v18 = vld [vmem:[#allocation2 + $0xe0] sm:$0xff]   ;;  %v2359_v24 = vld [vmem:[#allocation2 + $0x28] sm:$0xff]  }
  0x60   :  { %2118 = vmatprep.subr.bf16.mxu0 %v2346_v8  ;;  %v2353_v15 = vld [vmem:[#allocation2 + $0x98] sm:$0xff]   ;;  %v2357_v19 = vld [vmem:[#allocation2 + $0xa0] sm:$0xff]   ;;  %v2360_v25 = vld [vmem:[#allocation2 + $0xe8] sm:$0xff]  }
  0x61   :  { %2139 = vmatpush3.bf16.msra.mxu1 %v2345_v7  ;;  %v2361_v26 = vld [vmem:[#allocation2 + $0xa8] sm:$0xff]   ;;  %v2362_v27 = vld [vmem:[#allocation2 + $0x70] sm:$0xff]   ;;  %v2366_v33 = vld [vmem:[#allocation2 + $0x78] sm:$0xff]  }
  0x62   :  { %2140 = vmatprep.subr.bf16.mxu1 %v2348_v10  ;;  %v2363_v30 = vld [vmem:[#allocation2 + $0x30] sm:$0xff]   ;;  %v2367_v35 = vld [vmem:[#allocation2 + $0x38] sm:$0xff]   ;;  %v118_v37 = vld [vmem:[%s3003_s0] sm:$0x7f] }
  0x63   :  { %2119 = vmatpush3.bf16.msra.mxu0 %v2347_v9  ;;  %v2364_v31 = vld [vmem:[#allocation2 + $0xf0] sm:$0xff]   ;;  %v2368_v36 = vld [vmem:[#allocation2 + $0xf8] sm:$0xff]   ;;  %v239_v38 = vcombine.high %v118_v37, %v118_v37  ;;  %v246_v39 = vrot.slane %v118_v37, %v2837_v34  ;;  %v2371_v41 = vld [vmem:[#allocation2 + $0x140] sm:$0xff]  }
  0x64   :  { %2120 = vmatprep.subr.bf16.mxu0 %v2350_v12  ;;  %v2365_v32 = vld [vmem:[#allocation2 + $0xb0] sm:$0xff]   ;;  %v2370_v40 = vld [vmem:[#allocation2 + $0xb8] sm:$0xff]   ;;  %v2372_v47 = vld [vmem:[#allocation2 + $0x100] sm:$0xff]  }
  0x65   :  { %2141 = vmatpush3.bf16.msra.mxu1 %v2349_v11  ;;  %v254_v42 = vcombine.high %v246_v39, %v246_v39  ;;  %v262_v43 = vrot.slane %v246_v39, %v2837_v34  ;;  %v2845_v44 = vrot.slane %v239_v38, %v2837_v34  ;;  %v2374_v50 = vld [vmem:[#allocation2 + $0x148] sm:$0xff]   ;;  %v2373_v52 = vld [vmem:[#allocation2 + $0x180] sm:$0xff]   ;;  %v2377_v55 = vld [vmem:[#allocation2 + $0x150] sm:$0xff]  }
  0x66   :  { %2142 = vmatprep.subr.bf16.mxu1 %v2352_v14  ;;  %v2375_v54 = vld [vmem:[#allocation2 + $0x108] sm:$0xff]   ;;  %v2378_v57 = vld [vmem:[#allocation2 + $0x110] sm:$0xff]   ;;  %v2380_v58 = vld [vmem:[#allocation2 + $0x158] sm:$0xff]  }
  0x67   :  { %2121 = vmatpush3.bf16.msra.mxu0 %v2351_v13  ;;  %v276_v46 = vrot.slane %v254_v42, %v2837_v34  ;;  %v255_v48 = vcombine.high %v2845_v44, %v2845_v44  ;;  %v284_v49 = vcombine.high %v262_v43, %v262_v43  ;;  %v2376_v56 = vld [vmem:[#allocation2 + $0x188] sm:$0xff]   ;;  %v2379_v59 = vld [vmem:[#allocation2 + $0x190] sm:$0xff]   ;;  %v2381_v60 = vld [vmem:[#allocation2 + $0x118] sm:$0xff]   ;;  %v269_v10 = vrot.slane %v2845_v44, %v2837_v34 }
  0x68   :  { %2122 = vmatprep.subr.bf16.mxu0 %v2354_v16  ;;  %v2383_v61 = vld [vmem:[#allocation2 + $0x160] sm:$0xff]   ;;  %v2382_v62 = vld [vmem:[#allocation2 + $0x198] sm:$0xff]   ;;  %v2386_v0 = vld [vmem:[#allocation2 + $0x168] sm:$0xff]  }
  0x69   :  { %2143 = vmatpush3.bf16.msra.mxu1 %v2353_v15  ;;  %662 = vmatprep.mubr.bf16.mxu0 %v276_v46  ;;  %v286_v51 = vcombine.high %v276_v46, %v276_v46  ;;  %v283_v53 = vrot.slane %v255_v48, %v2837_v34  ;;  %v2384_v63 = vld [vmem:[#allocation2 + $0x120] sm:$0xff]   ;;  %v2387_v2 = vld [vmem:[#allocation2 + $0x128] sm:$0xff]   ;;  %v2389_v4 = vld [vmem:[#allocation2 + $0x170] sm:$0xff]   ;;  %v285_v11 = vcombine.high %v269_v10, %v269_v10 }
  0x6a   :  { %2144 = vmatprep.subr.bf16.mxu1 %v2356_v18  ;;  %v2385_v1 = vld [vmem:[#allocation2 + $0x1a0] sm:$0xff]   ;;  %v2388_v3 = vld [vmem:[#allocation2 + $0x1a8] sm:$0xff]   ;;  %v2390_v5 = vld [vmem:[#allocation2 + $0x130] sm:$0xff]  }
  0x6b   :  { %2123 = vmatpush3.bf16.msra.mxu0 %v2355_v17  ;;  %702 = vmatprep.mubr.bf16.mxu1 %v286_v51  ;;  %v2392_v6 = vld [vmem:[#allocation2 + $0x178] sm:$0xff]   ;;  %v2391_v7 = vld [vmem:[#allocation2 + $0x1b0] sm:$0xff]   ;;  %v2395_v12 = vld [vmem:[#allocation4] sm:$0xff]  }
  0x6c   :  { %2124 = vmatprep.subr.bf16.mxu0 %v2358_v20  ;;  %v2393_v8 = vld [vmem:[#allocation2 + $0x138] sm:$0xff]   ;;  %v2396_v13 = vld [vmem:[#allocation4 + $0x8] sm:$0xff]   ;;  %v2397_v14 = vld [vmem:[#allocation4 + $0x10] sm:$0xff]  }
  0x6d   :  { %2145 = vmatpush3.bf16.msra.mxu1 %v2357_v19  ;;  %v2394_v9 = vld [vmem:[#allocation2 + $0x1b8] sm:$0xff]   ;;  %v2399_v16 = vld [vmem:[#allocation4 + $0x20] sm:$0xff]   ;;  %v2400_v17 = vld [vmem:[#allocation4 + $0x28] sm:$0xff]  }
  0x6e   :  { %2146 = vmatprep.subr.bf16.mxu1 %v2360_v25  ;;  %v2398_v15 = vld [vmem:[#allocation4 + $0x18] sm:$0xff]   ;;  %v2401_v18 = vld [vmem:[#allocation4 + $0x30] sm:$0xff]   ;;  %v2403_v20 = vld [vmem:[%s3009_s6] ss:$8 sps:$4 sm:$0xff]  }
  0x6f   :  { %2125 = vmatpush3.bf16.msra.mxu0 %v2359_v24  ;;  %v2402_v19 = vld [vmem:[#allocation4 + $0x38] sm:$0xff]   ;;  %v2405_v21 = vld [vmem:[%s3009_s6 + $0x4] ss:$8 sps:$4 sm:$0xff]   ;;  %v2409_v25 = vld [vmem:[%s3009_s6 + $0x20] ss:$8 sps:$4 sm:$0xff]  }
  0x70   :  { %2126 = vmatprep.subr.bf16.mxu0 %v2362_v27  ;;  %v2408_v22 = vld [vmem:[%s3009_s6 + $0x14] ss:$8 sps:$4 sm:$0xff]   ;;  %v2406_v23 = vld [vmem:[%s3009_s6 + $0x10] ss:$8 sps:$4 sm:$0xff]   ;;  %v2411_v24 = vld [vmem:[%s3009_s6 + $0x24] ss:$8 sps:$4 sm:$0xff]  }
  0x71   :  { %2147 = vmatpush3.bf16.msra.mxu1 %v2361_v26  ;;  %v2414_v26 = vld [vmem:[%s3009_s6 + $0x34] ss:$8 sps:$4 sm:$0xff]   ;;  %v2412_v27 = vld [vmem:[%s3009_s6 + $0x30] ss:$8 sps:$4 sm:$0xff]   ;;  %v2417_v28 = vld [vmem:[%s3009_s6 + $0x44] ss:$8 sps:$4 sm:$0xff]  }
  0x72   :  { %2148 = vmatprep.subr.bf16.mxu1 %v2364_v31  ;;  %v2420_v31 = vld [vmem:[%s3009_s6 + $0x54] ss:$8 sps:$4 sm:$0xff]   ;;  %v1954_v37 = vld [vmem:[%s3006_s3] ss:$0 sm:$0xff] }
  0x73   :  { %2127 = vmatpush3.bf16.msra.mxu0 %v2363_v30  ;;  %v2415_v30 = vld [vmem:[%s3009_s6 + $0x40] ss:$8 sps:$4 sm:$0xff]  }
  0x74   :  { %2128 = vmatprep.subr.bf16.mxu0 %v2366_v33  ;;  %v2423_v33 = vld [vmem:[%s3009_s6 + $0x64] ss:$8 sps:$4 sm:$0xff]  }
  0x75   :  { %2149 = vmatpush3.bf16.msra.mxu1 %v2365_v32  ;;  %v2418_v32 = vld [vmem:[%s3009_s6 + $0x50] ss:$8 sps:$4 sm:$0xff]  }
  0x76   :  { %2150 = vmatprep.subr.bf16.mxu1 %v2368_v36 }
  0x77   :  { %2129 = vmatpush3.bf16.msra.mxu0 %v2367_v35  ;;  %v2421_v35 = vld [vmem:[%s3009_s6 + $0x60] ss:$8 sps:$4 sm:$0xff]  }
  0x78   :  { %2158 = vmatprep.subr.bf16.mxu0 %v2371_v41 }
  0x79   :  { %2151 = vmatpush3.bf16.msra.mxu1 %v2370_v40 }
  0x7a   :  { %2225 = vmatprep.subr.bf16.mxu1 %v2665_v45  ;;  %663 = vmatmul.mubr.bf16.vlgmr.msra.gmra.mrb[0].mxu0 %v262_v43 }
  0x7b   :  { %2159 = vmatpush3.bf16.msra.mxu0 %v2372_v47  ;;  %742 = vmatprep.mubr.bf16.mxu0 %v283_v53 }
  0x7c   :  { %703 = vmatmul.mubr.bf16.vlgmr.msra.gmra.mrb[0].mxu1 %v284_v49  ;;  %2160 = vmatprep.subr.bf16.mxu0 %v2374_v50 }
  0x7d   :  { %2226 = vmatpush3.bf16.msra.mxu1 %v2373_v52  ;;  %2241 = vmatprep.mubr.msk.bf16.mxu1 %vm2666_vm0, %v2665_v45 }
  0x7e   :  { %2227 = vmatprep.subr.bf16.mxu1 %v2665_v45 }
  0x7f   :  { %2161 = vmatpush3.bf16.msra.mxu0 %v2375_v54 }
  0x80   :  { %2162 = vmatprep.subr.bf16.mxu0 %v2377_v55 }
  0x81   :  { %2228 = vmatpush3.bf16.msra.mxu1 %v2376_v56 }
  0x82   :  { %2229 = vmatprep.subr.bf16.mxu1 %v2665_v45 }
  0x83   :  { %2163 = vmatpush3.bf16.msra.mxu0 %v2378_v57 }
  0x84   :  { %2164 = vmatprep.subr.bf16.mxu0 %v2380_v58 }
  0x85   :  { %2230 = vmatpush3.bf16.msra.mxu1 %v2379_v59 }
  0x86   :  { %2231 = vmatprep.subr.bf16.mxu1 %v2665_v45 }
  0x87   :  { %2165 = vmatpush3.bf16.msra.mxu0 %v2381_v60 }
  0x88   :  { %2166 = vmatprep.subr.bf16.mxu0 %v2383_v61 }
  0x89   :  { %2232 = vmatpush3.bf16.msra.mxu1 %v2382_v62 }
  0x8a   :  { %2233 = vmatprep.subr.bf16.mxu1 %v2665_v45 }
  0x8b   :  { %2167 = vmatpush3.bf16.msra.mxu0 %v2384_v63  ;;  %v2426_v63 = vld [vmem:[%s3009_s6 + $0x74] ss:$8 sps:$4 sm:$0xff]  }
  0x8c   :  { %2168 = vmatprep.subr.bf16.mxu0 %v2386_v0  ;;  %v2424_v0 = vld [vmem:[%s3009_s6 + $0x70] ss:$8 sps:$4 sm:$0xff]  }
  0x8d   :  { %2234 = vmatpush3.bf16.msra.mxu1 %v2385_v1  ;;  %v2667_v1 = vmov 0  }
  0x8e   :  { %2235 = vmatprep.subr.bf16.mxu1 %v2665_v45 }
  0x8f   :  { %2169 = vmatpush3.bf16.msra.mxu0 %v2387_v2  ;;  %v2427_v2 = vld [vmem:[#allocation6] sm:$0xff]  }
  0x90   :  { %2170 = vmatprep.subr.bf16.mxu0 %v2389_v4  ;;  %v2011_v4 = vld [vmem:[%s3008_s5] ss:$0 sm:$0xff] }
  0x91   :  { %2236 = vmatpush3.bf16.msra.mxu1 %v2388_v3  ;;  %v2428_v3 = vld [vmem:[#allocation6 + $0x8] sm:$0xff]  }
  0x92   :  { %2237 = vmatprep.subr.bf16.mxu1 %v2665_v45 }
  0x93   :  { %2171 = vmatpush3.bf16.msra.mxu0 %v2390_v5 }
  0x94   :  { %2172 = vmatprep.subr.bf16.mxu0 %v2392_v6 }
  0x95   :  { %2238 = vmatpush3.bf16.msra.mxu1 %v2391_v7 }
  0x96   :  { %2239 = vmatprep.subr.bf16.mxu1 %v2665_v45 }
  0x97   :  { %2173 = vmatpush3.bf16.msra.mxu0 %v2393_v8 }
  0x98   :  { %2245 = vmatprep.subr.bf16.mxu0 %v2665_v45 }
  0x99   :  { %2240 = vmatpush3.bf16.msra.mxu1 %v2394_v9 }
  0x9a   :  { %743 = vmatmul.mubr.bf16.vlgmr.msra.gmra.mrb[4].mxu0 %v269_v10  ;;  %1013 = vmatprep.subr.bf16.mxu1 %v2405_v21  ;;  %v2438_v21 = vld [vmem:[#allocation7 + $0x18] sm:$0xff]  }
  0x9b   :  { %2261 = vmatprep.mubr.msk.bf16.mxu0 %vm2666_vm0, %v2665_v45  ;;  %2246 = vmatpush3.bf16.msra.mxu0 %v2395_v12  ;;  %v2429_v12 = vld [vmem:[#allocation6 + $0x10] sm:$0xff]  }
  0x9c   :  { %2242 = vmatmul.mubr.bf16.vlgmr.msra.gmra.mrb[4].mxu1 %v285_v11  ;;  %2247 = vmatprep.subr.bf16.mxu0 %v2665_v45 }
  0x9d   :  { %1014 = vmatpush1.bf16.msra.mxu1 %v2403_v20  ;;  %1045 = vmatprep.mubr.bf16.mxu1 %v2667_v1  ;;  %v2437_v20 = vld [vmem:[#allocation7 + $0x10] sm:$0xff]  }
  0x9e   :  { %1015 = vmatprep.subr.bf16.mxu1 %v2408_v22  ;;  %v2439_v22 = vld [vmem:[#allocation7 + $0x20] sm:$0xff]  }
  0x9f   :  { %2248 = vmatpush3.bf16.msra.mxu0 %v2396_v13  ;;  %v2430_v13 = vld [vmem:[#allocation6 + $0x18] sm:$0xff]  }
  0xa0   :  { %2249 = vmatprep.subr.bf16.mxu0 %v2665_v45 }
  0xa1   :  { %1016 = vmatpush1.bf16.msra.mxu1 %v2406_v23  ;;  %v2440_v23 = vld [vmem:[#allocation7 + $0x28] sm:$0xff]  }
  0xa2   :  { %1017 = vmatprep.subr.bf16.mxu1 %v2411_v24  ;;  %v925_v24 = vsub.s32 0, %v2834_v29 }
  0xa3   :  { %2250 = vmatpush3.bf16.msra.mxu0 %v2397_v14  ;;  %v2431_v14 = vld [vmem:[#allocation6 + $0x20] sm:$0xff]  }
  0xa4   :  { %2251 = vmatprep.subr.bf16.mxu0 %v2665_v45 }
  0xa5   :  { %1018 = vmatpush1.bf16.msra.mxu1 %v2409_v25  ;;  %v921_v25 = vld [vmem:[%s3010_s7] sm:$0x3] }
  0xa6   :  { %1019 = vmatprep.subr.bf16.mxu1 %v2414_v26  ;;  %v929_v26 = vsub.s32 1, %v2834_v29 }
  0xa7   :  { %2252 = vmatpush3.bf16.msra.mxu0 %v2398_v15  ;;  %v2432_v15 = vld [vmem:[#allocation6 + $0x28] sm:$0xff]  }
  0xa8   :  { %2253 = vmatprep.subr.bf16.mxu0 %v2665_v45 }
  0xa9   :  { %1020 = vmatpush1.bf16.msra.mxu1 %v2412_v27  ;;  %v926_v27 = vrot.slane %v921_v25, %v925_v24 }
  0xaa   :  { %1021 = vmatprep.subr.bf16.mxu1 %v2417_v28  ;;  %v930_v28 = vrot.slane %v921_v25, %v929_v26  ;;  %v2488_v25 = vld [vmem:[#allocation9 + $0x190] ss:$28 sps:$4 sm:$0xff]  }
  0xab   :  { %2254 = vmatpush3.bf16.msra.mxu0 %v2399_v16  ;;  %v2433_v16 = vld [vmem:[#allocation6 + $0x30] sm:$0xff]  }
  0xac   :  { %2255 = vmatprep.subr.bf16.mxu0 %v2665_v45 }
  0xad   :  { %1022 = vmatpush1.bf16.msra.mxu1 %v2415_v30 }
  0xae   :  { %1023 = vmatprep.subr.bf16.mxu1 %v2420_v31 }
  0xaf   :  { %2256 = vmatpush3.bf16.msra.mxu0 %v2400_v17  ;;  %v2434_v17 = vld [vmem:[#allocation6 + $0x38] sm:$0xff]  }
  0xb0   :  { %2257 = vmatprep.subr.bf16.mxu0 %v2665_v45 }
  0xb1   :  { %1024 = vmatpush1.bf16.msra.mxu1 %v2418_v32 }
  0xb2   :  { %1025 = vmatprep.subr.bf16.mxu1 %v2423_v33 }
  0xb3   :  { %2258 = vmatpush3.bf16.msra.mxu0 %v2401_v18  ;;  %v2435_v18 = vld [vmem:[#allocation7] sm:$0xff]  }
  0xb4   :  { %2259 = vmatprep.subr.bf16.mxu0 %v2665_v45 }
  0xb5   :  { %1026 = vmatpush1.bf16.msra.mxu1 %v2421_v35 }
  0xb6   :  { %1027 = vmatprep.subr.bf16.mxu1 %v2426_v63  ;;  %v2037_v63 = vld [vmem:[%s3012_s9] ss:$0 sm:$0xff] }
  0xb7   :  { %2260 = vmatpush3.bf16.msra.mxu0 %v2402_v19  ;;  %v2436_v19 = vld [vmem:[#allocation7 + $0x8] sm:$0xff]  }
  0xb8   :  { %2265 = vmatprep.subr.bf16.mxu0 %v2665_v45 }
  0xb9   :  { %1028 = vmatpush1.bf16.msra.mxu1 %v2424_v0 }
  0xba   :  { %2285 = vmatprep.subr.bf16.mxu1 %v2665_v45 }
 0x14d   :  { %v2130_v36 = vpop.f32.mrb[0].mxu0 }
 0x14e   :  { %v2131_v38 = vpop.f32.mrb[1].mxu0 }
 0x14f   :  { %v2132_v39 = vadd.f32 %v2131_v38, %v2130_v36  ;;  %v2133_v40 = vpop.f32.mrb[2].mxu0  ;;  %v2152_v41 = vpop.f32.mrb[0].mxu1 }
 0x150   :  { %v2134_v42 = vpop.f32.mrb[3].mxu0  ;;  %v2153_v43 = vpop.f32.mrb[1].mxu1  ;;  %v1066_v40 = vld [vmem:[%s3004_s1] sm:$0x3] }
 0x151   :  { %v665_v44 = vadd.f32 %v2132_v39, %v1954_v37  ;;  %v2154_v46 = vadd.f32 %v2153_v43, %v2152_v41  ;;  %v2155_v47 = vpop.f32.mrb[2].mxu1 }
 0x152   :  { %v2156_v48 = vpop.f32.mrb[3].mxu1  ;;  %v2442_v47 = vld [vmem:[#allocation7 + $0x38] sm:$0xff]  }
 0x153   :  { %v705_v49 = vadd.f32 %v2154_v46, %v665_v44  ;;  %v2441_v46 = vld [vmem:[#allocation7 + $0x30] sm:$0xff]   ;;  %v2443_v48 = vld [vmem:[#allocation9] ss:$28 sps:$4 sm:$0xff]  }
 0x16d   :  { %v2174_v50 = vpop.f32.mrb[4].mxu0 }
 0x16e   :  { %v2175_v51 = vpop.f32.mrb[5].mxu0 }
 0x16f   :  { %v2176_v52 = vadd.f32 %v2175_v51, %v2174_v50  ;;  %v2177_v53 = vpop.f32.mrb[6].mxu0  ;;  %v784_v54 = vpop.f32.mrb[4].mxu1  ;;  %v2448_v50 = vld [vmem:[#allocation9 + $0xc] ss:$28 sps:$4 sm:$0xff]   ;;  %v2451_v51 = vld [vmem:[#allocation9 + $0x3c] ss:$28 sps:$4 sm:$0xff]  }
 0x170   :  { %v2178_v55 = vpop.f32.mrb[7].mxu0  ;;  %v2243_v56 = vpop.f32.mrb[5].mxu1  ;;  %v2457_v53 = vld [vmem:[#allocation9 + $0x74] ss:$28 sps:$4 sm:$0xff]  }
 0x171   :  { %v745_v57 = vadd.f32 %v2176_v52, %v705_v49  ;;  %v787_v58 = vpop.f32.mrb[6].mxu1  ;;  %v2445_v49 = vld [vmem:[#allocation9 + $0x4] ss:$28 sps:$4 sm:$0xff]   ;;  %v2449_v52 = vld [vmem:[#allocation9 + $0x38] ss:$28 sps:$4 sm:$0xff]  }
 0x172   :  { %v2244_v59 = vpop.f32.mrb[7].mxu1  ;;  %v2463_v55 = vld [vmem:[#allocation9 + $0xac] ss:$28 sps:$4 sm:$0xff]   ;;  %v2467_v58 = vld [vmem:[#allocation9 + $0xe0] ss:$28 sps:$4 sm:$0xff]  }
 0x173   :  { %v785_v60 = vadd.f32 %v784_v54, %v745_v57  ;;  %v2455_v54 = vld [vmem:[#allocation9 + $0x70] ss:$28 sps:$4 sm:$0xff]   ;;  %v2461_v56 = vld [vmem:[#allocation9 + $0xa8] ss:$28 sps:$4 sm:$0xff]   ;;  %v2475_v59 = vld [vmem:[#allocation9 + $0x11c] ss:$28 sps:$4 sm:$0xff]  }
 0x174   :  { %v2469_v57 = vld [vmem:[#allocation9 + $0xe4] ss:$28 sps:$4 sm:$0xff]  }
 0x175   :  { %v790_v61 = vmax.f32 %v785_v60, 0.0  ;;  %v2473_v60 = vld [vmem:[#allocation9 + $0x118] ss:$28 sps:$4 sm:$0xff]  }
 0x177   :  { %v791_v62 = vpack.c.bf16 %v790_v61, %v790_v61  ;;  %v2481_v61 = vld [vmem:[#allocation9 + $0x154] ss:$28 sps:$4 sm:$0xff]  }
 0x179   :  { %2262 = vmatmul.mubr.bf16.vlgmr.msra.gmra.mrb[8].mxu0 %v791_v62  ;;  %v2479_v62 = vld [vmem:[#allocation9 + $0x150] ss:$28 sps:$4 sm:$0xff]  }
 0x17a   :  { %2281 = vmatprep.mubr.msk.bf16.mxu0 %vm2666_vm0, %v2665_v45  ;;  %2266 = vmatpush3.bf16.msra.mxu0 %v2427_v2 }
 0x17b   :  { %2267 = vmatprep.subr.bf16.mxu0 %v2665_v45 }
 0x17e   :  { %2268 = vmatpush3.bf16.msra.mxu0 %v2428_v3 }
 0x17f   :  { %2269 = vmatprep.subr.bf16.mxu0 %v2665_v45 }
 0x182   :  { %2270 = vmatpush3.bf16.msra.mxu0 %v2429_v12  ;;  %v2458_v12 = vld [vmem:[#allocation9 + $0x78] ss:$28 sps:$4 sm:$0xff]  }
 0x183   :  { %2271 = vmatprep.subr.bf16.mxu0 %v2665_v45 }
 0x186   :  { %2272 = vmatpush3.bf16.msra.mxu0 %v2430_v13  ;;  %v2466_v13 = vld [vmem:[#allocation9 + $0xb4] ss:$28 sps:$4 sm:$0xff]  }
 0x187   :  { %2273 = vmatprep.subr.bf16.mxu0 %v2665_v45 }
 0x18a   :  { %2274 = vmatpush3.bf16.msra.mxu0 %v2431_v14  ;;  %v2464_v14 = vld [vmem:[#allocation9 + $0xb0] ss:$28 sps:$4 sm:$0xff]  }
 0x18b   :  { %2275 = vmatprep.subr.bf16.mxu0 %v2665_v45 }
 0x18e   :  { %2276 = vmatpush3.bf16.msra.mxu0 %v2432_v15  ;;  %v2472_v15 = vld [vmem:[#allocation9 + $0xec] ss:$28 sps:$4 sm:$0xff]  }
 0x18f   :  { %2277 = vmatprep.subr.bf16.mxu0 %v2665_v45 }
 0x192   :  { %2278 = vmatpush3.bf16.msra.mxu0 %v2433_v16  ;;  %v2470_v16 = vld [vmem:[#allocation9 + $0xe8] ss:$28 sps:$4 sm:$0xff]  }
 0x193   :  { %2279 = vmatprep.subr.bf16.mxu0 %v2665_v45 }
 0x196   :  { %2280 = vmatpush3.bf16.msra.mxu0 %v2434_v17  ;;  %v2478_v17 = vld [vmem:[#allocation9 + $0x124] ss:$28 sps:$4 sm:$0xff]  }
 0x197   :  { %1688 = vmatprep.subr.bf16.mxu0 %v2445_v49  ;;  %v2506_v49 = vld [vmem:[#allocation9 + $0xc0] ss:$28 sps:$4 sm:$0xff]  }
 0x24c   :  { %v897_v5 = vpop.f32.mrb[8].mxu0 }
 0x24d   :  { %v898_v6 = vadd.f32 %v2011_v4, %v897_v5  ;;  %v2263_v7 = vpop.f32.mrb[9].mxu0 }
 0x24e   :  { %v900_v8 = vpop.f32.mrb[10].mxu0  ;;  %v2446_v7 = vld [vmem:[#allocation9 + $0x8] ss:$28 sps:$4 sm:$0xff]  }
 0x24f   :  { %v903_v9 = vmax.f32 %v898_v6, 0.0  ;;  %v2264_v10 = vpop.f32.mrb[11].mxu0 }
 0x250   :  { %v2452_v10 = vld [vmem:[#allocation9 + $0x40] ss:$28 sps:$4 sm:$0xff]  }
 0x251   :  { %v904_v11 = vpack.c.bf16 %v903_v9, %v903_v9  ;;  %v2454_v9 = vld [vmem:[#allocation9 + $0x44] ss:$28 sps:$4 sm:$0xff]  }
 0x253   :  { %1046 = vmatmul.mubr.bf16.vlgmr.msra.gmra.mrb[8].mxu1 %v904_v11  ;;  %v2460_v11 = vld [vmem:[#allocation9 + $0x7c] ss:$28 sps:$4 sm:$0xff]  }
 0x254   :  { %2301 = vmatprep.mubr.msk.bf16.mxu1 %vm2666_vm0, %v2665_v45  ;;  %2286 = vmatpush3.bf16.msra.mxu1 %v2435_v18  ;;  %v2476_v18 = vld [vmem:[#allocation9 + $0x120] ss:$28 sps:$4 sm:$0xff]  }
 0x255   :  { %2287 = vmatprep.subr.bf16.mxu1 %v2665_v45 }
 0x258   :  { %2288 = vmatpush3.bf16.msra.mxu1 %v2436_v19  ;;  %v2484_v19 = vld [vmem:[#allocation9 + $0x15c] ss:$28 sps:$4 sm:$0xff]  }
 0x259   :  { %2289 = vmatprep.subr.bf16.mxu1 %v2665_v45 }
 0x25c   :  { %2290 = vmatpush3.bf16.msra.mxu1 %v2437_v20  ;;  %v2482_v20 = vld [vmem:[#allocation9 + $0x158] ss:$28 sps:$4 sm:$0xff]  }
 0x25d   :  { %2291 = vmatprep.subr.bf16.mxu1 %v2665_v45 }
 0x260   :  { %2292 = vmatpush3.bf16.msra.mxu1 %v2438_v21  ;;  %v2487_v21 = vld [vmem:[#allocation9 + $0x18c] ss:$28 sps:$4 sm:$0xff]  }
 0x261   :  { %2293 = vmatprep.subr.bf16.mxu1 %v2665_v45 }
 0x264   :  { %2294 = vmatpush3.bf16.msra.mxu1 %v2439_v22  ;;  %v2490_v22 = vld [vmem:[#allocation9 + $0x194] ss:$28 sps:$4 sm:$0xff]  }
 0x265   :  { %2295 = vmatprep.subr.bf16.mxu1 %v2665_v45 }
 0x268   :  { %2296 = vmatpush3.bf16.msra.mxu1 %v2440_v23  ;;  %v2485_v23 = vld [vmem:[#allocation9 + $0x188] ss:$28 sps:$4 sm:$0xff]  }
 0x269   :  { %2297 = vmatprep.subr.bf16.mxu1 %v2665_v45 }
 0x26c   :  { %2298 = vmatpush3.bf16.msra.mxu1 %v2441_v46  ;;  %v2502_v46 = vld [vmem:[#allocation9 + $0x88] ss:$28 sps:$4 sm:$0xff]  }
 0x26d   :  { %2299 = vmatprep.subr.bf16.mxu1 %v2665_v45 }
 0x270   :  { %2300 = vmatpush3.bf16.msra.mxu1 %v2442_v47  ;;  %v2505_v47 = vld [vmem:[#allocation9 + $0xbc] ss:$28 sps:$4 sm:$0xff]  }
 0x271   :  { %1729 = vmatprep.subr.bf16.mxu1 %v2448_v50  ;;  %v2509_v50 = vld [vmem:[#allocation9 + $0xf4] ss:$28 sps:$4 sm:$0xff]  }
 0x326   :  { %v1047_v30 = vpop.f32.mrb[8].mxu1 }
 0x327   :  { %v1048_v31 = vadd.f32 %v1047_v30, %v926_v27  ;;  %v1049_v32 = vpop.f32.mrb[9].mxu1  ;;  %v2493_v27 = vld [vmem:[#allocation9 + $0x14] ss:$28 sps:$4 sm:$0xff]  }
 0x328   :  { %v1050_v33 = vadd.f32 %v1049_v32, %v930_v28  ;;  %v1051_v35 = vpop.f32.mrb[10].mxu1  ;;  %v2046_v28 = vld [vmem:[%s3014_s11] ss:$0 sm:$0xff] }
 0x329   :  { %v1052_v36 = vpop.f32.mrb[11].mxu1 }
 0x32a   :  { %v1056_v37 = vcombine.low %v1048_v31, %v1050_v33  ;;  %v1067_v38 = vmul.f32 0.5, %v1050_v33 }
 0x32c   :  { %2036 = vst.sshfl [vmem:[%s3018_s15] sm:$0x33 pattern:$0x76325410] %v1056_v37  ;;  %v1068_v39 = vmul.f32 1.442695, %v1067_v38 }
 0x32d   :  { %v2491_v37 = vld [vmem:[#allocation9 + $0x10] ss:$28 sps:$4 sm:$0xff]   ;;  %v2494_v38 = vld [vmem:[#allocation9 + $0x18] ss:$28 sps:$4 sm:$0xff]  }
 0x32e   :  { %2523 = vpow2.f32 %v1068_v39 }
 0x338   :  { %v2524_v41 = vpop.eup %2523 }
 0x339   :  { %v1070_v42 = vmul.f32 %v2524_v41, %v1066_v40  ;;  %v2497_v40 = vld [vmem:[#allocation9 + $0x4c] ss:$28 sps:$4 sm:$0xff]  }
 0x33a   :  { %v2495_v41 = vld [vmem:[#allocation9 + $0x48] ss:$28 sps:$4 sm:$0xff]  }
 0x33b   :  { %v1071_v43 = vadd.f32 %v1070_v42, %v1048_v31  ;;  %v2498_v42 = vld [vmem:[#allocation9 + $0x50] ss:$28 sps:$4 sm:$0xff]  }
 0x33d   :  { %v1072_v44 = vpack.c.bf16 %v1071_v43, %v1071_v43  ;;  %v2501_v43 = vld [vmem:[#allocation9 + $0x84] ss:$28 sps:$4 sm:$0xff]  }
 0x33f   :  { %2282 = vmatmul.mubr.bf16.vlgmr.msra.gmra.mrb[12].mxu0 %v1072_v44  ;;  %v2499_v44 = vld [vmem:[#allocation9 + $0x80] ss:$28 sps:$4 sm:$0xff]  }
 0x340   :  { %1720 = vmatprep.mubr.bf16.mxu0 %v2667_v1  ;;  %1689 = vmatpush1.bf16.msra.mxu0 %v2443_v48  ;;  %v2503_v48 = vld [vmem:[#allocation9 + $0xb8] ss:$28 sps:$4 sm:$0xff]  }
 0x341   :  { %1690 = vmatprep.subr.bf16.mxu0 %v2451_v51  ;;  %v2510_v51 = vld [vmem:[#allocation9 + $0xf8] ss:$28 sps:$4 sm:$0xff]  }
 0x344   :  { %1691 = vmatpush1.bf16.msra.mxu0 %v2449_v52  ;;  %v2513_v52 = vld [vmem:[#allocation9 + $0x12c] ss:$28 sps:$4 sm:$0xff]  }
 0x345   :  { %1692 = vmatprep.subr.bf16.mxu0 %v2457_v53  ;;  %v2511_v53 = vld [vmem:[#allocation9 + $0x128] ss:$28 sps:$4 sm:$0xff]  }
 0x348   :  { %1693 = vmatpush1.bf16.msra.mxu0 %v2455_v54  ;;  %v2514_v54 = vld [vmem:[#allocation9 + $0x130] ss:$28 sps:$4 sm:$0xff]  }
 0x349   :  { %1694 = vmatprep.subr.bf16.mxu0 %v2463_v55  ;;  %v2517_v55 = vld [vmem:[#allocation9 + $0x164] ss:$28 sps:$4 sm:$0xff]  }
 0x34c   :  { %1695 = vmatpush1.bf16.msra.mxu0 %v2461_v56  ;;  %v2515_v56 = vld [vmem:[#allocation9 + $0x160] ss:$28 sps:$4 sm:$0xff]  }
 0x34d   :  { %1696 = vmatprep.subr.bf16.mxu0 %v2469_v57  ;;  %v2518_v57 = vld [vmem:[#allocation9 + $0x168] ss:$28 sps:$4 sm:$0xff]  }
 0x350   :  { %1697 = vmatpush1.bf16.msra.mxu0 %v2467_v58  ;;  %v2521_v58 = vld [vmem:[#allocation9 + $0x19c] ss:$28 sps:$4 sm:$0xff]  }
 0x351   :  { %1698 = vmatprep.subr.bf16.mxu0 %v2475_v59  ;;  %v2519_v59 = vld [vmem:[#allocation9 + $0x198] ss:$28 sps:$4 sm:$0xff]  }
 0x354   :  { %1699 = vmatpush1.bf16.msra.mxu0 %v2473_v60  ;;  %v2522_v60 = vld [vmem:[#allocation9 + $0x1a0] ss:$28 sps:$4 sm:$0xff]  }
 0x355   :  { %1700 = vmatprep.subr.bf16.mxu0 %v2481_v61  ;;  %v1375_v61 = vsub.s32 2, %v2834_v29 }
 0x358   :  { %1701 = vmatpush1.bf16.msra.mxu0 %v2479_v62  ;;  %v1363_v62 = vld [vmem:[%s3016_s13] sm:$0xff] }
 0x359   :  { %1702 = vmatprep.subr.bf16.mxu0 %v2487_v21 }
 0x35c   :  { %1703 = vmatpush1.bf16.msra.mxu0 %v2485_v23 }
 0x35d   :  { %1770 = vmatprep.subr.bf16.mxu0 %v2493_v27 }
 0x412   :  { %v1178_v0 = vpop.f32.mrb[12].mxu0 }
 0x413   :  { %v1179_v2 = vadd.f32 %v2037_v63, %v1178_v0  ;;  %v2283_v3 = vpop.f32.mrb[13].mxu0  ;;  %v1379_v63 = vsub.s32 3, %v2834_v29  ;;  %v1368_v0 = vrot.slane %v1363_v62, %v925_v24 }
 0x414   :  { %v1181_v4 = vpop.f32.mrb[14].mxu0  ;;  %v1372_v3 = vrot.slane %v1363_v62, %v929_v26 }
 0x415   :  { %v1184_v5 = vmax.f32 %v1179_v2, 0.0  ;;  %v2284_v6 = vpop.f32.mrb[15].mxu0  ;;  %v1376_v2 = vrot.slane %v1363_v62, %v1375_v61 }
 0x417   :  { %v1185_v8 = vpack.c.bf16 %v1184_v5, %v1184_v5 }
 0x419   :  { %2302 = vmatmul.mubr.bf16.vlgmr.msra.gmra.mrb[12].mxu1 %v1185_v8 }
 0x41a   :  { %1730 = vmatpush1.bf16.msra.mxu1 %v2446_v7  ;;  %1761 = vmatprep.mubr.bf16.mxu1 %v2667_v1 }
 0x41b   :  { %1731 = vmatprep.subr.bf16.mxu1 %v2454_v9 }
 0x41e   :  { %1732 = vmatpush1.bf16.msra.mxu1 %v2452_v10 }
 0x41f   :  { %1733 = vmatprep.subr.bf16.mxu1 %v2460_v11 }
 0x422   :  { %1734 = vmatpush1.bf16.msra.mxu1 %v2458_v12 }
 0x423   :  { %1735 = vmatprep.subr.bf16.mxu1 %v2466_v13 }
 0x426   :  { %1736 = vmatpush1.bf16.msra.mxu1 %v2464_v14 }
 0x427   :  { %1737 = vmatprep.subr.bf16.mxu1 %v2472_v15 }
 0x42a   :  { %1738 = vmatpush1.bf16.msra.mxu1 %v2470_v16 }
 0x42b   :  { %1739 = vmatprep.subr.bf16.mxu1 %v2478_v17 }
 0x42e   :  { %1740 = vmatpush1.bf16.msra.mxu1 %v2476_v18 }
 0x42f   :  { %1741 = vmatprep.subr.bf16.mxu1 %v2484_v19 }
 0x432   :  { %1742 = vmatpush1.bf16.msra.mxu1 %v2482_v20 }
 0x433   :  { %1743 = vmatprep.subr.bf16.mxu1 %v2490_v22 }
 0x436   :  { %1744 = vmatpush1.bf16.msra.mxu1 %v2488_v25 }
 0x437   :  { %2305 = vmatprep.subr.bf16.mxu1 %v2665_v45 }
 0x4ec   :  { %v1291_v30 = vpop.f32.mrb[12].mxu1 }
 0x4ed   :  { %v1292_v31 = vadd.f32 %v2046_v28, %v1291_v30  ;;  %v2303_v32 = vpop.f32.mrb[13].mxu1 }
 0x4ee   :  { %v1294_v33 = vpop.f32.mrb[14].mxu1 }
 0x4ef   :  { %v1297_v35 = vmax.f32 %v1292_v31, 0.0  ;;  %v2304_v36 = vpop.f32.mrb[15].mxu1 }
 0x4f1   :  { %v1298_v39 = vpack.c.bf16 %v1297_v35, %v1297_v35 }
 0x4f3   :  { %1721 = vmatmul.mubr.bf16.vlgmr.msra.gmra.mrb[16].mxu0 %v1298_v39  ;;  %1762 = vmatmul.mubr.bf16.vlgmr.msra.gmra.mrb[16].mxu1 %v1298_v39 }
 0x4f4   :  { %1771 = vmatpush1.bf16.msra.mxu0 %v2491_v37  ;;  %2306 = vmatpush3.bf16.msra.mxu1 %v2494_v38  ;;  %v1383_v38 = vsub.s32 4, %v2834_v29 }
 0x4f5   :  { %1772 = vmatprep.subr.bf16.mxu0 %v2497_v40  ;;  %2307 = vmatprep.subr.bf16.mxu1 %v2665_v45  ;;  %v1387_v40 = vsub.s32 5, %v2834_v29 }
 0x4f6   :  { %1802 = vmatprep.mubr.bf16.mxu0 %v2667_v1  ;;  %2321 = vmatprep.mubr.msk.bf16.mxu1 %vm2666_vm0, %v2665_v45  ;;  %v2507_v1 = vld [vmem:[#allocation9 + $0xf0] ss:$28 sps:$4 sm:$0xff]  }
 0x4f8   :  { %1773 = vmatpush1.bf16.msra.mxu0 %v2495_v41  ;;  %2308 = vmatpush3.bf16.msra.mxu1 %v2498_v42  ;;  %v1384_v42 = vrot.slane %v1363_v62, %v1383_v38 }
 0x4f9   :  { %1774 = vmatprep.subr.bf16.mxu0 %v2501_v43  ;;  %2309 = vmatprep.subr.bf16.mxu1 %v2665_v45 }
 0x4fc   :  { %1775 = vmatpush1.bf16.msra.mxu0 %v2499_v44  ;;  %2310 = vmatpush3.bf16.msra.mxu1 %v2502_v46  ;;  %v1388_v44 = vrot.slane %v1363_v62, %v1387_v40 }
 0x4fd   :  { %1776 = vmatprep.subr.bf16.mxu0 %v2505_v47  ;;  %2311 = vmatprep.subr.bf16.mxu1 %v2665_v45 }
 0x500   :  { %1777 = vmatpush1.bf16.msra.mxu0 %v2503_v48  ;;  %2312 = vmatpush3.bf16.msra.mxu1 %v2506_v49 }
 0x501   :  { %1778 = vmatprep.subr.bf16.mxu0 %v2509_v50  ;;  %2313 = vmatprep.subr.bf16.mxu1 %v2665_v45 }
 0x504   :  { %1779 = vmatpush1.bf16.msra.mxu0 %v2507_v1  ;;  %2314 = vmatpush3.bf16.msra.mxu1 %v2510_v51 }
 0x505   :  { %1780 = vmatprep.subr.bf16.mxu0 %v2513_v52  ;;  %2315 = vmatprep.subr.bf16.mxu1 %v2665_v45 }
 0x508   :  { %1781 = vmatpush1.bf16.msra.mxu0 %v2511_v53  ;;  %2316 = vmatpush3.bf16.msra.mxu1 %v2514_v54 }
 0x509   :  { %1782 = vmatprep.subr.bf16.mxu0 %v2517_v55  ;;  %2317 = vmatprep.subr.bf16.mxu1 %v2665_v45 }
 0x50c   :  { %1783 = vmatpush1.bf16.msra.mxu0 %v2515_v56  ;;  %2318 = vmatpush3.bf16.msra.mxu1 %v2518_v57 }
 0x50d   :  { %1784 = vmatprep.subr.bf16.mxu0 %v2521_v58  ;;  %2319 = vmatprep.subr.bf16.mxu1 %v2665_v45  ;;  %v1380_v45 = vrot.slane %v1363_v62, %v1379_v63 }
 0x510   :  { %1785 = vmatpush1.bf16.msra.mxu0 %v2519_v59  ;;  %2320 = vmatpush3.bf16.msra.mxu1 %v2522_v60 }
 0x513   :  { %1803 = vmatmul.mubr.bf16.vlgmr.msra.gmra.mrb[20].mxu0 %v1298_v39  ;;  %2322 = vmatmul.mubr.bf16.vlgmr.msra.gmra.mrb[20].mxu1 %v1298_v39  ;;  %v1391_v39 = vsub.s32 6, %v2834_v29 }
 0x515   :  { %v1392_v43 = vrot.slane %v1363_v62, %v1391_v39 }
 0x5c6   :  { %v1722_v4 = vpop.f32.mrb[16].mxu0  ;;  %v1763_v5 = vpop.f32.mrb[16].mxu1 }
 0x5c7   :  { %v1723_v6 = vadd.f32 %v1722_v4, %v1368_v0  ;;  %v1764_v7 = vadd.f32 %v1763_v5, %v1376_v2  ;;  %v1724_v8 = vpop.f32.mrb[17].mxu0  ;;  %v1765_v9 = vpop.f32.mrb[17].mxu1 }
 0x5c8   :  { %v1725_v10 = vadd.f32 %v1724_v8, %v1372_v3  ;;  %v1766_v11 = vadd.f32 %v1765_v9, %v1380_v45  ;;  %v1726_v12 = vpop.f32.mrb[18].mxu0  ;;  %v1767_v13 = vpop.f32.mrb[18].mxu1 }
 0x5c9   :  { %v1851_v14 = vmul.f32 0.5, %v1723_v6  ;;  %v1853_v15 = vmul.f32 0.5, %v1764_v7  ;;  %v1727_v16 = vpop.f32.mrb[19].mxu0  ;;  %v1768_v17 = vpop.f32.mrb[19].mxu1 }
 0x5ca   :  { %v1852_v24 = vmul.f32 0.5, %v1725_v10  ;;  %v1854_v18 = vmul.f32 0.5, %v1766_v11 }
 0x5cb   :  { %2525 = vtanh.f32 %v1851_v14 }
 0x5cc   :  { %2527 = vtanh.f32 %v1853_v15 }
 0x5cd   :  { %2529 = vtanh.f32 %v1852_v24 }
 0x5ce   :  { %2531 = vtanh.f32 %v1854_v18 }
 0x5d5   :  { %v2526_v26 = vpop.eup %2525 }
 0x5d6   :  { %v2528_v19 = vpop.eup %2527  ;;  %v1865_v20 = vmul.f32 0.5, %v2526_v26 }
 0x5d7   :  { %v2530_v21 = vpop.eup %2529  ;;  %v1867_v22 = vmul.f32 0.5, %v2528_v19 }
 0x5d8   :  { %v2532_v23 = vpop.eup %2531  ;;  %v1872_v25 = vadd.f32 0.5, %v1865_v20  ;;  %v1866_v27 = vmul.f32 0.5, %v2530_v21 }
 0x5d9   :  { %v1874_v28 = vadd.f32 0.5, %v1867_v22  ;;  %v1868_v30 = vmul.f32 0.5, %v2532_v23 }
 0x5da   :  { %v1873_v31 = vadd.f32 0.5, %v1866_v27 }
 0x5db   :  { %v1875_v32 = vadd.f32 0.5, %v1868_v30 }
 0x5dc   :  { %v2111_v33 = vpack.c.bf16 %v1873_v31, %v1872_v25 }
 0x5dd   :  { %v2112_v35 = vpack.c.bf16 %v1875_v32, %v1874_v28 }
 0x5de   :  { %v1902_v36 = vrot.slane %v2111_v33, %v2837_v34 }
 0x5df   :  { %v1909_v37 = vrot.slane %v2112_v35, %v2837_v34 }
 0x5e1   :  { %v1924_v41 = vcombine.low %v1902_v36, %v1909_v37 }
 0x5e3   :  { %v1932_v8 = vrot.slane %v1924_v41, %v2837_v34 }
 0x5e6   :  { %v1804_v46 = vpop.f32.mrb[20].mxu0  ;;  %v1845_v47 = vpop.f32.mrb[20].mxu1 }
 0x5e7   :  { %v1805_v48 = vadd.f32 %v1804_v46, %v1384_v42  ;;  %v1846_v49 = vadd.f32 %v1845_v47, %v1392_v43  ;;  %v1806_v50 = vpop.f32.mrb[21].mxu0  ;;  %v2323_v1 = vpop.f32.mrb[21].mxu1 }
 0x5e8   :  { %v1807_v51 = vadd.f32 %v1806_v50, %v1388_v44  ;;  %v1808_v52 = vpop.f32.mrb[22].mxu0  ;;  %v1848_v53 = vpop.f32.mrb[22].mxu1 }
 0x5e9   :  { %v1855_v54 = vmul.f32 0.5, %v1805_v48  ;;  %v1857_v55 = vmul.f32 0.5, %v1846_v49  ;;  %v1809_v56 = vpop.f32.mrb[23].mxu0  ;;  %v2324_v57 = vpop.f32.mrb[23].mxu1 }
 0x5ea   :  { %v1856_v58 = vmul.f32 0.5, %v1807_v51 }
 0x5eb   :  { %2533 = vtanh.f32 %v1855_v54 }
 0x5ec   :  { %2535 = vtanh.f32 %v1857_v55 }
 0x5ed   :  { %2537 = vtanh.f32 %v1856_v58 }
 0x5f5   :  { %v2534_v29 = vpop.eup %2533 }
 0x5f6   :  { %v2536_v59 = vpop.eup %2535  ;;  %v1869_v60 = vmul.f32 0.5, %v2534_v29 }
 0x5f7   :  { %v2538_v61 = vpop.eup %2537  ;;  %v1871_v62 = vmul.f32 0.5, %v2536_v59 }
 0x5f8   :  { %v1876_v63 = vadd.f32 0.5, %v1869_v60  ;;  %v1870_v0 = vmul.f32 0.5, %v2538_v61 }
 0x5f9   :  { %v1878_v2 = vadd.f32 0.5, %v1871_v62 }
 0x5fa   :  { %v1877_v3 = vadd.f32 0.5, %v1870_v0 }
 0x5fb   :  { %v1885_v45 = vpack.c.bf16 %v1878_v2, %v1878_v2 }
 0x5fc   :  { %v2113_v4 = vpack.c.bf16 %v1877_v3, %v1876_v63 }
 0x5fd   :  { %v1923_v5 = vrot.slane %v1885_v45, %v2837_v34 }
 0x5fe   :  { %v1916_v6 = vrot.slane %v2113_v4, %v2837_v34 }
 0x600   :  { %v1925_v7 = vcombine.low %v1916_v6, %v1923_v5 }
 0x602   :  { %v1939_v9 = vrot.slane %v1925_v7, %v2837_v34 }
 0x604   :  { %v1940_v10 = vcombine.low %v1932_v8, %v1939_v9 }
 0x606   :  { %1942 = vst [vmem:[%s3017_s14] sm:$0x7f] %v1940_v10 }
 0x607   :  { %1951 = vsyncpa [#allocation3], 1 }
 0x608   :  { %1952 = vsyncpa [#allocation5], 1 }
 0x609   :  { %1953 = vsyncpa [#allocation8], 1 }

</bundles_post_ra>
